<compile_context>
chip_gen: v7x
topology: tpu7x:2x2x1
jax: 0.10.0
libtpu: 0.0.40
codegen_flags: <defaults>
</compile_context>

<pallas_src>
import jax
import jax.numpy as jnp
from jax.experimental import pallas as pl
from jax.experimental.pallas import tpu as pltpu

_OUT_LANES = 128  # lane-dense output width (col 0 = mu, col 1 = logvar)


def _leaky_relu(x, slope=0.01):
    # nn.LeakyReLU() default negative_slope = 0.01
    return jnp.where(x > 0, x, slope * x)


def _round_up(n, m):
    return ((n + m - 1) // m) * m


def _dino_head_kernel(
    pooled_ref,   # [Bb, Dp]          bf16  mean-pooled patches (batch block)
    wpe_ref,      # [Dp, Ddino]       bf16  frozen-DINO stand-in patch embed
    w1_ref,       # [Ddino, Hd]       bf16  embedding_to_hidden.weight^T
    b1_ref,       # [1, Hd]           f32
    w2_ref,       # [Hd, Hd]          bf16  hidden_to_hidden.weight^T
    b2_ref,       # [1, Hd]           f32
    wout_ref,     # [Hd, _OUT_LANES]  f32   [mu | logvar | zeros...] weight^T
    bout_ref,     # [1, _OUT_LANES]   f32
    out_ref,      # [Bb, _OUT_LANES]  f32   col 0 = mu, col 1 = logvar (unclamped)
):
    # ---- frozen DINO stand-in: bf16 MXU matmul, f32 accumulation ----
    h = jnp.dot(pooled_ref[...], wpe_ref[...],
                preferred_element_type=jnp.float32)              # [Bb, Ddino]

    # ---- regression head (bf16 MXU operands, f32 bias / activation) ----
    h1 = jnp.dot(h.astype(jnp.bfloat16), w1_ref[...],
                 preferred_element_type=jnp.float32) + b1_ref[...]
    h1 = _leaky_relu(h1)
    # dropout: eval mode -> identity
    h2 = jnp.dot(h1.astype(jnp.bfloat16), w2_ref[...],
                 preferred_element_type=jnp.float32) + b2_ref[...]
    h2 = _leaky_relu(h2)

    # fused mu/logvar head, lane-padded to 128 (padding cols are exact zeros)
    out = jnp.dot(h2, wout_ref[...],
                  preferred_element_type=jnp.float32) + bout_ref[...]
    out_ref[...] = out.astype(out_ref.dtype)


def _pool_patches(x, patch):
    """Mean over patches of patchified NCHW image -> [B, C*patch*patch].

    No transpose: reshape + reduce only, so XLA does a single read pass."""
    B, C, H, W = x.shape
    nH, nW = H // patch, W // patch
    return (
        x.astype(jnp.float32)
        .reshape(B, C, nH, patch, nW, patch)
        .mean(axis=(2, 4))
        .reshape(B, C * patch * patch)
    )


def dino_regression_hetero_images(x, params, *, patch=8, batch_block=1024):
    """x: [B, C, H, W] float32 (NCHW). Returns (mu [B], logvar [B])."""
    B, C, H, W = x.shape
    assert H % patch == 0 and W % patch == 0
    Dp = C * patch * patch

    # ---- glue: patch mean-pool folded through the linear patch-embed ----
    pooled = _pool_patches(x, patch)                              # [B, Dp] f32

    (wpe, w1, b1, w2, b2, wmu, bmu, wlv, blv) = params
    Hd = w1.shape[1]

    # fuse mu / logvar heads and zero-pad to a lane-dense [Hd, 128] matmul
    wout = jnp.pad(jnp.concatenate([wmu, wlv], axis=1),
                   ((0, 0), (0, _OUT_LANES - 2)))                 # [Hd, 128]
    bout = jnp.pad(jnp.concatenate([bmu, blv], axis=1),
                   ((0, 0), (0, _OUT_LANES - 2)))                 # [1, 128]

    # ---- batch tiling: 16-aligned blocks (bf16 sublane packing) ----
    batch_block = _round_up(batch_block, 16)
    Bb = min(batch_block, _round_up(B, 16))
    if Bb == _round_up(B, 16) and B > 16:
        # keep >= 2 grid steps so the "parallel" axis shards across both
        # TensorCores on v7x (single-TC chips are unaffected)
        Bb = _round_up(-(-B // 2), 16)
    Bp = _round_up(B, Bb)
    pooled = jnp.pad(pooled, ((0, Bp - B), (0, 0)))

    # bf16 operands for the MXU matmuls (accumulation stays f32 in-kernel)
    pooled_bf16 = pooled.astype(jnp.bfloat16)
    wpe_bf16 = wpe.astype(jnp.bfloat16)
    w1_bf16 = w1.astype(jnp.bfloat16)
    w2_bf16 = w2.astype(jnp.bfloat16)

    def build(single_buffer_weights):
        def wspec(a):
            # constant index map -> weights resident across all grid steps
            if single_buffer_weights:
                return pl.BlockSpec(a.shape, lambda i: (0,) * a.ndim,
                                    pipeline_mode=pl.Buffered(1))
            return pl.BlockSpec(a.shape, lambda i: (0,) * a.ndim)

        return pl.pallas_call(
            _dino_head_kernel,
            out_shape=jax.ShapeDtypeStruct((Bp, _OUT_LANES), jnp.float32),
            grid=(Bp // Bb,),
            in_specs=[
                pl.BlockSpec((Bb, Dp), lambda i: (i, 0)),   # pooled patches
                wspec(wpe_bf16),
                wspec(w1_bf16), wspec(b1),
                wspec(w2_bf16), wspec(b2),
                wspec(wout), wspec(bout),
            ],
            out_specs=pl.BlockSpec((Bb, _OUT_LANES), lambda i: (i, 0)),
            compiler_params=pltpu.CompilerParams(
                dimension_semantics=("parallel",),
            ),
        )

    args = (pooled_bf16, wpe_bf16, w1_bf16, b1, w2_bf16, b2, wout, bout)
    try:
        out = jax.block_until_ready(build(True)(*args))
    except Exception:
        # this jax version rejects single-buffered BlockSpecs -> default buffering
        out = build(False)(*args)

    # drop batch padding + padded lanes; clamp logvar (module semantics)
    mu = out[:B, 0]
    logvar = jnp.clip(out[:B, 1], -10.0, 3.0)
    return mu, logvar


def dino_regression_reference(x, params, *, patch=8):
    """Pure-JAX f32 reference of the same forward (for tolerance checks)."""
    pooled = _pool_patches(x, patch)
    (wpe, w1, b1, w2, b2, wmu, bmu, wlv, blv) = params
    h = pooled @ wpe
    h1 = _leaky_relu(h @ w1 + b1)
    h2 = _leaky_relu(h1 @ w2 + b2)
    mu = (h2 @ wmu + bmu)[:, 0]
    logvar = jnp.clip((h2 @ wlv + blv)[:, 0], -10.0, 3.0)
    return mu, logvar


def init_params(key, *, dp, dino_dim, hidden_dim):
    ks = jax.random.split(key, 9)

    def lin(k, fan_in, shape):
        bound = 1.0 / jnp.sqrt(fan_in)
        return jax.random.uniform(k, shape, jnp.float32, -bound, bound)

    wpe = lin(ks[0], dp, (dp, dino_dim))                     # frozen DINO stand-in
    w1 = lin(ks[1], dino_dim, (dino_dim, hidden_dim))        # embedding_to_hidden
    b1 = lin(ks[2], dino_dim, (1, hidden_dim))
    w2 = lin(ks[3], hidden_dim, (hidden_dim, hidden_dim))    # hidden_to_hidden
    b2 = lin(ks[4], hidden_dim, (1, hidden_dim))
    wmu = lin(ks[5], hidden_dim, (hidden_dim, 1))            # out_mu
    bmu = lin(ks[6], hidden_dim, (1, 1))
    wlv = lin(ks[7], hidden_dim, (hidden_dim, 1))            # out_logvar
    blv = lin(ks[8], hidden_dim, (1, 1))
    return (wpe, w1, b1, w2, b2, wmu, bmu, wlv, blv)


if __name__ == "__main__":
    key = jax.random.PRNGKey(0)
    kx, kp = jax.random.split(key)

    # small shapes consistent with the module's forward
    B, C, Himg, Wimg = 2, 4, 16, 16
    PATCH = 8
    DINO_DIM = 128
    HIDDEN = 32
    DP = C * PATCH * PATCH

    x = jax.random.normal(kx, (B, C, Himg, Wimg), jnp.float32)
    params = init_params(kp, dp=DP, dino_dim=DINO_DIM, hidden_dim=HIDDEN)

    mu, logvar = dino_regression_hetero_images(x, params, patch=PATCH)
    jax.block_until_ready((mu, logvar))

    assert mu.shape == (B,) and logvar.shape == (B,)
    assert bool(jnp.all(logvar >= -10.0)) and bool(jnp.all(logvar <= 3.0))
    assert bool(jnp.all(jnp.isfinite(mu))) and bool(jnp.all(jnp.isfinite(logvar)))

    # tolerance check against a pure-JAX f32 reference (bf16 MXU operands)
    mu_ref, logvar_ref = dino_regression_reference(x, params, patch=PATCH)
    assert bool(jnp.allclose(mu, mu_ref, atol=3e-2, rtol=3e-2)), (mu, mu_ref)
    assert bool(jnp.allclose(logvar, logvar_ref, atol=3e-2, rtol=3e-2)), (logvar, logvar_ref)

    print("KERNEL_OK")
</pallas_src>

<mosaic_0001>
module attributes {stable_mosaic.version = 11 : i64} {
  func.func @_dino_head_kernel(%arg0: i32, %arg1: memref<16x256xbf16, #tpu.memory_space<vmem>>, %arg2: memref<256x128xbf16, #tpu.memory_space<vmem>>, %arg3: memref<128x32xbf16, #tpu.memory_space<vmem>>, %arg4: memref<1x32xf32, #tpu.memory_space<vmem>>, %arg5: memref<32x32xbf16, #tpu.memory_space<vmem>>, %arg6: memref<1x32xf32, #tpu.memory_space<vmem>>, %arg7: memref<32x128xf32, #tpu.memory_space<vmem>>, %arg8: memref<1x128xf32, #tpu.memory_space<vmem>>, %arg9: memref<16x128xf32, #tpu.memory_space<vmem>>) attributes {dimension_semantics = [#tpu.dimension_semantics<parallel>], iteration_bounds = array<i64: 1>, scalar_prefetch = 0 : i64, scratch_operands = 0 : i64, tpu.core_type = #tpu.core_type<tc>, window_params = [{transform_indices = @transform_0, window_bounds = array<i64: 16, 256>}, {pipeline_mode = #tpu.pipeline_mode<synchronous>, transform_indices = @transform_1, window_bounds = array<i64: 256, 128>}, {pipeline_mode = #tpu.pipeline_mode<synchronous>, transform_indices = @transform_2, window_bounds = array<i64: 128, 32>}, {pipeline_mode = #tpu.pipeline_mode<synchronous>, transform_indices = @transform_3, window_bounds = array<i64: 1, 32>}, {pipeline_mode = #tpu.pipeline_mode<synchronous>, transform_indices = @transform_4, window_bounds = array<i64: 32, 32>}, {pipeline_mode = #tpu.pipeline_mode<synchronous>, transform_indices = @transform_5, window_bounds = array<i64: 1, 32>}, {pipeline_mode = #tpu.pipeline_mode<synchronous>, transform_indices = @transform_6, window_bounds = array<i64: 32, 128>}, {pipeline_mode = #tpu.pipeline_mode<synchronous>, transform_indices = @transform_7, window_bounds = array<i64: 1, 128>}, {transform_indices = @transform_8, window_bounds = array<i64: 16, 128>}]} {
    %c0 = arith.constant 0 : index
    %c0_0 = arith.constant 0 : index
    %0 = vector.load %arg1[%c0, %c0_0] : memref<16x256xbf16, #tpu.memory_space<vmem>>, vector<16x256xbf16>
    %c0_1 = arith.constant 0 : index
    %c0_2 = arith.constant 0 : index
    %1 = vector.load %arg2[%c0_1, %c0_2] : memref<256x128xbf16, #tpu.memory_space<vmem>>, vector<256x128xbf16>
    %cst = arith.constant dense<0.000000e+00> : vector<16x128xf32>
    %2 = tpu.matmul %0, %1, %cst {dimension_numbers = #tpu.dot_dimension_numbers<[1], [0], [0], [1], [0, 0, 1, 1], [], []>} : vector<16x256xbf16>, vector<256x128xbf16>, vector<16x128xf32> -> vector<16x128xf32>
    %3 = arith.truncf %2 : vector<16x128xf32> to vector<16x128xbf16>
    %c0_3 = arith.constant 0 : index
    %c0_4 = arith.constant 0 : index
    %4 = vector.load %arg3[%c0_3, %c0_4] : memref<128x32xbf16, #tpu.memory_space<vmem>>, vector<128x32xbf16>
    %cst_5 = arith.constant dense<0.000000e+00> : vector<16x32xf32>
    %5 = tpu.matmul %3, %4, %cst_5 {dimension_numbers = #tpu.dot_dimension_numbers<[1], [0], [0], [1], [0, 0, 1, 1], [], []>} : vector<16x128xbf16>, vector<128x32xbf16>, vector<16x32xf32> -> vector<16x32xf32>
    %c0_6 = arith.constant 0 : index
    %c0_7 = arith.constant 0 : index
    %6 = vector.load %arg4[%c0_6, %c0_7] : memref<1x32xf32, #tpu.memory_space<vmem>>, vector<1x32xf32>
    %7 = vector.broadcast %6 : vector<1x32xf32> to vector<16x32xf32>
    %8 = arith.addf %5, %7 : vector<16x32xf32>
    %cst_8 = arith.constant 0.000000e+00 : f32
    %9 = vector.broadcast %cst_8 : f32 to vector<16x32xf32>
    %10 = arith.cmpf ogt, %8, %9 : vector<16x32xf32>
    %cst_9 = arith.constant 0.00999999977 : f32
    %11 = vector.broadcast %cst_9 : f32 to vector<16x32xf32>
    %12 = arith.mulf %11, %8 : vector<16x32xf32>
    %13 = arith.select %10, %8, %12 : vector<16x32xi1>, vector<16x32xf32>
    %14 = arith.truncf %13 : vector<16x32xf32> to vector<16x32xbf16>
    %c0_10 = arith.constant 0 : index
    %c0_11 = arith.constant 0 : index
    %15 = vector.load %arg5[%c0_10, %c0_11] : memref<32x32xbf16, #tpu.memory_space<vmem>>, vector<32x32xbf16>
    %cst_12 = arith.constant dense<0.000000e+00> : vector<16x32xf32>
    %16 = tpu.matmul %14, %15, %cst_12 {dimension_numbers = #tpu.dot_dimension_numbers<[1], [0], [0], [1], [0, 0, 1, 1], [], []>} : vector<16x32xbf16>, vector<32x32xbf16>, vector<16x32xf32> -> vector<16x32xf32>
    %c0_13 = arith.constant 0 : index
    %c0_14 = arith.constant 0 : index
    %17 = vector.load %arg6[%c0_13, %c0_14] : memref<1x32xf32, #tpu.memory_space<vmem>>, vector<1x32xf32>
    %18 = vector.broadcast %17 : vector<1x32xf32> to vector<16x32xf32>
    %19 = arith.addf %16, %18 : vector<16x32xf32>
    %cst_15 = arith.constant 0.000000e+00 : f32
    %20 = vector.broadcast %cst_15 : f32 to vector<16x32xf32>
    %21 = arith.cmpf ogt, %19, %20 : vector<16x32xf32>
    %cst_16 = arith.constant 0.00999999977 : f32
    %22 = vector.broadcast %cst_16 : f32 to vector<16x32xf32>
    %23 = arith.mulf %22, %19 : vector<16x32xf32>
    %24 = arith.select %21, %19, %23 : vector<16x32xi1>, vector<16x32xf32>
    %c0_17 = arith.constant 0 : index
    %c0_18 = arith.constant 0 : index
    %25 = vector.load %arg7[%c0_17, %c0_18] : memref<32x128xf32, #tpu.memory_space<vmem>>, vector<32x128xf32>
    %cst_19 = arith.constant dense<0.000000e+00> : vector<16x128xf32>
    %26 = tpu.matmul %24, %25, %cst_19 {dimension_numbers = #tpu.dot_dimension_numbers<[1], [0], [0], [1], [0, 0, 1, 1], [], []>} : vector<16x32xf32>, vector<32x128xf32>, vector<16x128xf32> -> vector<16x128xf32>
    %c0_20 = arith.constant 0 : index
    %c0_21 = arith.constant 0 : index
    %27 = vector.load %arg8[%c0_20, %c0_21] : memref<1x128xf32, #tpu.memory_space<vmem>>, vector<1x128xf32>
    %28 = vector.broadcast %27 : vector<1x128xf32> to vector<16x128xf32>
    %29 = arith.addf %26, %28 : vector<16x128xf32>
    %c0_22 = arith.constant 0 : index
    %c0_23 = arith.constant 0 : index
    %30 = vector.load %arg9[%c0_22, %c0_23] : memref<16x128xf32, #tpu.memory_space<vmem>>, vector<16x128xf32>
    tpu.vector_store %arg9[%c0_22, %c0_23], %29 {strides = array<i32>} : memref<16x128xf32, #tpu.memory_space<vmem>>, vector<16x128xf32>,
    return
  }
  func.func @transform_0(%arg0: i32) -> (i32, i32) {
    %c0_i32 = arith.constant 0 : i32
    %c0_i32_0 = arith.constant 0 : i32
    return %arg0, %c0_i32 : i32, i32
  }
  func.func @transform_1(%arg0: i32) -> (i32, i32) {
    %c0_i32 = arith.constant 0 : i32
    %c0_i32_0 = arith.constant 0 : i32
    %c0_i32_1 = arith.constant 0 : i32
    return %c0_i32, %c0_i32_0 : i32, i32
  }
  func.func @transform_2(%arg0: i32) -> (i32, i32) {
    %c0_i32 = arith.constant 0 : i32
    %c0_i32_0 = arith.constant 0 : i32
    %c0_i32_1 = arith.constant 0 : i32
    return %c0_i32, %c0_i32_0 : i32, i32
  }
  func.func @transform_3(%arg0: i32) -> (i32, i32) {
    %c0_i32 = arith.constant 0 : i32
    %c0_i32_0 = arith.constant 0 : i32
    %c0_i32_1 = arith.constant 0 : i32
    return %c0_i32, %c0_i32_0 : i32, i32
  }
  func.func @transform_4(%arg0: i32) -> (i32, i32) {
    %c0_i32 = arith.constant 0 : i32
    %c0_i32_0 = arith.constant 0 : i32
    %c0_i32_1 = arith.constant 0 : i32
    return %c0_i32, %c0_i32_0 : i32, i32
  }
  func.func @transform_5(%arg0: i32) -> (i32, i32) {
    %c0_i32 = arith.constant 0 : i32
    %c0_i32_0 = arith.constant 0 : i32
    %c0_i32_1 = arith.constant 0 : i32
    return %c0_i32, %c0_i32_0 : i32, i32
  }
  func.func @transform_6(%arg0: i32) -> (i32, i32) {
    %c0_i32 = arith.constant 0 : i32
    %c0_i32_0 = arith.constant 0 : i32
    %c0_i32_1 = arith.constant 0 : i32
    return %c0_i32, %c0_i32_0 : i32, i32
  }
  func.func @transform_7(%arg0: i32) -> (i32, i32) {
    %c0_i32 = arith.constant 0 : i32
    %c0_i32_0 = arith.constant 0 : i32
    %c0_i32_1 = arith.constant 0 : i32
    return %c0_i32, %c0_i32_0 : i32, i32
  }
  func.func @transform_8(%arg0: i32) -> (i32, i32) {
    %c0_i32 = arith.constant 0 : i32
    %c0_i32_0 = arith.constant 0 : i32
    return %arg0, %c0_i32 : i32, i32
  }
}

module attributes {stable_mosaic.version = 11 : i64} {
  func.func @_dino_head_kernel(%arg0: i32, %arg1: memref<16x256xbf16, #tpu.memory_space<vmem>>, %arg2: memref<256x128xbf16, #tpu.memory_space<vmem>>, %arg3: memref<128x32xbf16, #tpu.memory_space<vmem>>, %arg4: memref<1x32xf32, #tpu.memory_space<vmem>>, %arg5: memref<32x32xbf16, #tpu.memory_space<vmem>>, %arg6: memref<1x32xf32, #tpu.memory_space<vmem>>, %arg7: memref<32x128xf32, #tpu.memory_space<vmem>>, %arg8: memref<1x128xf32, #tpu.memory_space<vmem>>, %arg9: memref<16x128xf32, #tpu.memory_space<vmem>>) attributes {dimension_semantics = [#tpu.dimension_semantics<parallel>], iteration_bounds = array<i64: 1>, scalar_prefetch = 0 : i64, scratch_operands = 0 : i64, tpu.core_type = #tpu.core_type<tc>, window_params = [{transform_indices = @transform_0, window_bounds = array<i64: 16, 256>}, {pipeline_mode = #tpu.pipeline_mode<synchronous>, transform_indices = @transform_1, window_bounds = array<i64: 256, 128>}, {pipeline_mode = #tpu.pipeline_mode<synchronous>, transform_indices = @transform_2, window_bounds = array<i64: 128, 32>}, {pipeline_mode = #tpu.pipeline_mode<synchronous>, transform_indices = @transform_3, window_bounds = array<i64: 1, 32>}, {pipeline_mode = #tpu.pipeline_mode<synchronous>, transform_indices = @transform_4, window_bounds = array<i64: 32, 32>}, {pipeline_mode = #tpu.pipeline_mode<synchronous>, transform_indices = @transform_5, window_bounds = array<i64: 1, 32>}, {pipeline_mode = #tpu.pipeline_mode<synchronous>, transform_indices = @transform_6, window_bounds = array<i64: 32, 128>}, {pipeline_mode = #tpu.pipeline_mode<synchronous>, transform_indices = @transform_7, window_bounds = array<i64: 1, 128>}, {transform_indices = @transform_8, window_bounds = array<i64: 16, 128>}]} {
    %c0 = arith.constant 0 : index
    %c0_0 = arith.constant 0 : index
    %0 = vector.load %arg1[%c0, %c0_0] : memref<16x256xbf16, #tpu.memory_space<vmem>>, vector<16x256xbf16>
    %c0_1 = arith.constant 0 : index
    %c0_2 = arith.constant 0 : index
    %1 = vector.load %arg2[%c0_1, %c0_2] : memref<256x128xbf16, #tpu.memory_space<vmem>>, vector<256x128xbf16>
    %cst = arith.constant dense<0.000000e+00> : vector<16x128xf32>
    %2 = tpu.matmul %0, %1, %cst {dimension_numbers = #tpu.dot_dimension_numbers<[1], [0], [0], [1], [0, 0, 1, 1], [], []>} : vector<16x256xbf16>, vector<256x128xbf16>, vector<16x128xf32> -> vector<16x128xf32>
    %3 = arith.truncf %2 : vector<16x128xf32> to vector<16x128xbf16>
    %c0_3 = arith.constant 0 : index
    %c0_4 = arith.constant 0 : index
    %4 = vector.load %arg3[%c0_3, %c0_4] : memref<128x32xbf16, #tpu.memory_space<vmem>>, vector<128x32xbf16>
    %cst_5 = arith.constant dense<0.000000e+00> : vector<16x32xf32>
    %5 = tpu.matmul %3, %4, %cst_5 {dimension_numbers = #tpu.dot_dimension_numbers<[1], [0], [0], [1], [0, 0, 1, 1], [], []>} : vector<16x128xbf16>, vector<128x32xbf16>, vector<16x32xf32> -> vector<16x32xf32>
    %c0_6 = arith.constant 0 : index
    %c0_7 = arith.constant 0 : index
    %6 = vector.load %arg4[%c0_6, %c0_7] : memref<1x32xf32, #tpu.memory_space<vmem>>, vector<1x32xf32>
    %7 = vector.broadcast %6 : vector<1x32xf32> to vector<16x32xf32>
    %8 = arith.addf %5, %7 : vector<16x32xf32>
    %cst_8 = arith.constant 0.000000e+00 : f32
    %9 = vector.broadcast %cst_8 : f32 to vector<16x32xf32>
    %10 = arith.cmpf ogt, %8, %9 : vector<16x32xf32>
    %cst_9 = arith.constant 0.00999999977 : f32
    %11 = vector.broadcast %cst_9 : f32 to vector<16x32xf32>
    %12 = arith.mulf %11, %8 : vector<16x32xf32>
    %13 = arith.select %10, %8, %12 : vector<16x32xi1>, vector<16x32xf32>
    %14 = arith.truncf %13 : vector<16x32xf32> to vector<16x32xbf16>
    %c0_10 = arith.constant 0 : index
    %c0_11 = arith.constant 0 : index
    %15 = vector.load %arg5[%c0_10, %c0_11] : memref<32x32xbf16, #tpu.memory_space<vmem>>, vector<32x32xbf16>
    %cst_12 = arith.constant dense<0.000000e+00> : vector<16x32xf32>
    %16 = tpu.matmul %14, %15, %cst_12 {dimension_numbers = #tpu.dot_dimension_numbers<[1], [0], [0], [1], [0, 0, 1, 1], [], []>} : vector<16x32xbf16>, vector<32x32xbf16>, vector<16x32xf32> -> vector<16x32xf32>
    %c0_13 = arith.constant 0 : index
    %c0_14 = arith.constant 0 : index
    %17 = vector.load %arg6[%c0_13, %c0_14] : memref<1x32xf32, #tpu.memory_space<vmem>>, vector<1x32xf32>
    %18 = vector.broadcast %17 : vector<1x32xf32> to vector<16x32xf32>
    %19 = arith.addf %16, %18 : vector<16x32xf32>
    %cst_15 = arith.constant 0.000000e+00 : f32
    %20 = vector.broadcast %cst_15 : f32 to vector<16x32xf32>
    %21 = arith.cmpf ogt, %19, %20 : vector<16x32xf32>
    %cst_16 = arith.constant 0.00999999977 : f32
    %22 = vector.broadcast %cst_16 : f32 to vector<16x32xf32>
    %23 = arith.mulf %22, %19 : vector<16x32xf32>
    %24 = arith.select %21, %19, %23 : vector<16x32xi1>, vector<16x32xf32>
    %c0_17 = arith.constant 0 : index
    %c0_18 = arith.constant 0 : index
    %25 = vector.load %arg7[%c0_17, %c0_18] : memref<32x128xf32, #tpu.memory_space<vmem>>, vector<32x128xf32>
    %cst_19 = arith.constant dense<0.000000e+00> : vector<16x128xf32>
    %26 = tpu.matmul %24, %25, %cst_19 {dimension_numbers = #tpu.dot_dimension_numbers<[1], [0], [0], [1], [0, 0, 1, 1], [], []>} : vector<16x32xf32>, vector<32x128xf32>, vector<16x128xf32> -> vector<16x128xf32>
    %c0_20 = arith.constant 0 : index
    %c0_21 = arith.constant 0 : index
    %27 = vector.load %arg8[%c0_20, %c0_21] : memref<1x128xf32, #tpu.memory_space<vmem>>, vector<1x128xf32>
    %28 = vector.broadcast %27 : vector<1x128xf32> to vector<16x128xf32>
    %29 = arith.addf %26, %28 : vector<16x128xf32>
    %c0_22 = arith.constant 0 : index
    %c0_23 = arith.constant 0 : index
    %30 = vector.load %arg9[%c0_22, %c0_23] : memref<16x128xf32, #tpu.memory_space<vmem>>, vector<16x128xf32>
    tpu.vector_store %arg9[%c0_22, %c0_23], %29 {strides = array<i32>} : memref<16x128xf32, #tpu.memory_space<vmem>>, vector<16x128xf32>,
    return
  }
  func.func @transform_0(%arg0: i32) -> (i32, i32) {
    %c0_i32 = arith.constant 0 : i32
    %c0_i32_0 = arith.constant 0 : i32
    return %arg0, %c0_i32 : i32, i32
  }
  func.func @transform_1(%arg0: i32) -> (i32, i32) {
    %c0_i32 = arith.constant 0 : i32
    %c0_i32_0 = arith.constant 0 : i32
    %c0_i32_1 = arith.constant 0 : i32
    return %c0_i32, %c0_i32_0 : i32, i32
  }
  func.func @transform_2(%arg0: i32) -> (i32, i32) {
    %c0_i32 = arith.constant 0 : i32
    %c0_i32_0 = arith.constant 0 : i32
    %c0_i32_1 = arith.constant 0 : i32
    return %c0_i32, %c0_i32_0 : i32, i32
  }
  func.func @transform_3(%arg0: i32) -> (i32, i32) {
    %c0_i32 = arith.constant 0 : i32
    %c0_i32_0 = arith.constant 0 : i32
    %c0_i32_1 = arith.constant 0 : i32
    return %c0_i32, %c0_i32_0 : i32, i32
  }
  func.func @transform_4(%arg0: i32) -> (i32, i32) {
    %c0_i32 = arith.constant 0 : i32
    %c0_i32_0 = arith.constant 0 : i32
    %c0_i32_1 = arith.constant 0 : i32
    return %c0_i32, %c0_i32_0 : i32, i32
  }
  func.func @transform_5(%arg0: i32) -> (i32, i32) {
    %c0_i32 = arith.constant 0 : i32
    %c0_i32_0 = arith.constant 0 : i32
    %c0_i32_1 = arith.constant 0 : i32
    return %c0_i32, %c0_i32_0 : i32, i32
  }
  func.func @transform_6(%arg0: i32) -> (i32, i32) {
    %c0_i32 = arith.constant 0 : i32
    %c0_i32_0 = arith.constant 0 : i32
    %c0_i32_1 = arith.constant 0 : i32
    return %c0_i32, %c0_i32_0 : i32, i32
  }
  func.func @transform_7(%arg0: i32) -> (i32, i32) {
    %c0_i32 = arith.constant 0 : i32
    %c0_i32_0 = arith.constant 0 : i32
    %c0_i32_1 = arith.constant 0 : i32
    return %c0_i32, %c0_i32_0 : i32, i32
  }
  func.func @transform_8(%arg0: i32) -> (i32, i32) {
    %c0_i32 = arith.constant 0 : i32
    %c0_i32_0 = arith.constant 0 : i32
    return %arg0, %c0_i32 : i32, i32
  }
}

</mosaic_0001>

<bundles_post_ra>
// kernel: tpu_custom_call.1
= control target key start
LH: loop header
LB: loop body
LE: loop exit
PB: predicated region body
PF: predicated region fallthrough
CT: control target
= control target key end

     0   :  { %13 = vsyncpa [#allocation3], 0  ;;  %s886_s0 = inlined_call_operand.vmem [shape: bf16[16,256], index: 0, kind: input, shape index: {}]   ;;  %s887_s1 = inlined_call_operand.hbm [shape: bf16[256,128], index: 1, kind: input, shape index: {}]   ;;  %s888_s2 = inlined_call_operand.vmem [shape: bf16[128,32], index: 2, kind: input, shape index: {}]   ;;  %s889_s3 = inlined_call_operand.vmem [shape: f32[1,32], index: 3, kind: input, shape index: {}]   ;;  %s890_s4 = inlined_call_operand.vmem [shape: bf16[32,32], index: 4, kind: input, shape index: {}]   ;;  %s891_s5 = inlined_call_operand.vmem [shape: f32[1,32], index: 5, kind: input, shape index: {}]   ;;  %s892_s6 = inlined_call_operand.vmem [shape: f32[32,128], index: 6, kind: input, shape index: {}]   ;;  %s893_s7 = inlined_call_operand.vmem [shape: f32[1,128], index: 7, kind: input, shape index: {}]   ;;  %s894_s8 = inlined_call_operand.hbm [shape: f32[16,128], index: 8, kind: output, shape index: {}]  }
   0x1   :  { %14 = vsyncpa [#allocation4], 0  ;;  %s737_s27 = smov [#allocation2]   ;;  %s689_s9 = scalar_lea.hbm %s887_s1, 2048 }
   0x2   :  { %s22_s28 = sshll.u32 %s737_s27, 4  ;;  %p690_p0 = scmp.ne.s32.totalorder %s887_s1, %s689_s9  ;;  %s23_s28 = int_to_ptr.vmem [resolvable:$true] %s22_s28 }
   0x3   :  { %p693_p1 = scmp.lt.u32.totalorder %s689_s9, %s887_s1 }
   0x5   :  { %p695_p2 = pnand %p693_p1, %p690_p0 }
   0x7   :  { %698 = shalt.err (!%p695_p2)
}
   0x8   :  { %s699_s14 = scalar_lea.vmem %s23_s28, 2048  ;;  %p704_p4 = scmp.lt.s32.totalorder %s23_s28, %s23_s28 }
   0x9   :  { %p700_p3 = scmp.ne.s32.totalorder %s23_s28, %s699_s14  ;;  %p705_p5 = scmp.lt.s32.totalorder %s699_s14, %s699_s14 }
   0xb   :  { %p706_p6 = por %p705_p5, %p704_p4 }
   0xd   :  { %p707_p7 = pnand %p706_p6, %p700_p3 }
   0xf   :  { %710 = shalt.err (!%p707_p7)
}
  0x10   :  { %s738_s15 = smov 64   ;;  %s739_s16 = smov 4  }
  0x11   :  { %28 = dma.hbm_to_vmem [thread:$0]  %s887_s1, 2048, %s23_s28, [#allocation3], %s738_s15, %s738_s15, %s739_s16  }
  0x12   :  { %733 = dma.done.wait [#allocation3], 2048  }
  0x13   :  { %734 = vsyncadd [#allocation3], 4294965248  ;;  %v740_v0 = vmov 0.0   ;;  %v660_v1 = vld [vmem:[#allocation2 + $0x40] sm:$0xff]   ;;  %v662_v3 = vld [vmem:[#allocation2 + $0x48] sm:$0xff]   ;;  %vm741_vm0 = vmmov 0  }
  0x14   :  { %605 = vmatprep.subr.bf16.mxu1 %v740_v0  ;;  %v661_v2 = vld [vmem:[#allocation2] sm:$0xff]   ;;  %565 = vmatprep.subr.bf16.mxu0 %v660_v1  ;;  %v663_v4 = vld [vmem:[#allocation2 + $0x8] sm:$0xff]   ;;  %v664_v5 = vld [vmem:[#allocation2 + $0x50] sm:$0xff]   ;;  %vm369_vm3 = vcmask 261120  }
  0x15   :  { %566 = vmatpush3.bf16.msra.mxu0 %v661_v2  ;;  %v665_v6 = vld [vmem:[#allocation2 + $0x10] sm:$0xff]   ;;  %v666_v7 = vld [vmem:[#allocation2 + $0x58] sm:$0xff]   ;;  %v668_v9 = vld [vmem:[#allocation2 + $0x60] sm:$0xff]   ;;  %621 = vmatprep.mubr.msk.bf16.mxu1 %vm741_vm0, %v740_v0 }
  0x16   :  { %567 = vmatprep.subr.bf16.mxu0 %v662_v3  ;;  %v667_v8 = vld [vmem:[#allocation2 + $0x18] sm:$0xff]   ;;  %v669_v10 = vld [vmem:[#allocation2 + $0x20] sm:$0xff]   ;;  %v670_v11 = vld [vmem:[#allocation2 + $0x68] sm:$0xff]  }
  0x17   :  { %v671_v12 = vld [vmem:[#allocation2 + $0x28] sm:$0xff]   ;;  %v679_v14 = vld [vmem:[%s888_s2] sm:$0xff]   ;;  %v672_v15 = vld [vmem:[#allocation2 + $0x70] sm:$0xff]  }
  0x18   :  { %v678_v13 = vld [vmem:[%s886_s0 + $0x4] ss:$8 sps:$4 sm:$0xff]   ;;  %606 = vmatpush3.bf16.msra.mxu1 %v679_v14  ;;  %v673_v17 = vld [vmem:[#allocation2 + $0x30] sm:$0xff]   ;;  %v674_v18 = vld [vmem:[#allocation2 + $0x78] sm:$0xff]  }
  0x19   :  { %568 = vmatpush3.bf16.msra.mxu0 %v663_v4  ;;  %217 = vmatprep.mubr.bf16.mxu0 %v678_v13  ;;  %v680_v16 = vld [vmem:[%s888_s2 + $0x8] sm:$0xff]   ;;  %v681_v19 = vld [vmem:[%s888_s2 + $0x10] sm:$0xff]   ;;  %v675_v20 = vld [vmem:[#allocation2 + $0x38] sm:$0xff]  }
  0x1a   :  { %569 = vmatprep.subr.bf16.mxu0 %v664_v5  ;;  %607 = vmatprep.subr.bf16.mxu1 %v740_v0  ;;  %v682_v21 = vld [vmem:[%s888_s2 + $0x18] sm:$0xff]   ;;  %v676_v22 = vld [vmem:[%s886_s0] ss:$8 sps:$4 sm:$0xff]   ;;  %v685_v25 = vld [vmem:[%s888_s2 + $0x30] sm:$0xff]  }
  0x1b   :  { %v683_v23 = vld [vmem:[%s888_s2 + $0x20] sm:$0xff]   ;;  %v684_v24 = vld [vmem:[%s888_s2 + $0x28] sm:$0xff]   ;;  %v686_v26 = vld [vmem:[%s888_s2 + $0x38] sm:$0xff]  }
  0x1c   :  { %608 = vmatpush3.bf16.msra.mxu1 %v680_v16  ;;  %v687_v34 = vld [vmem:[%s890_s4] sm:$0xff]   ;;  %v688_v35 = vld [vmem:[%s890_s4 + $0x8] sm:$0xff]   ;;  %v422_v51 = vld [vmem:[%s892_s6 + $0x10] sm:$0xff] }
  0x1d   :  { %570 = vmatpush3.bf16.msra.mxu0 %v665_v6  ;;  %609 = vmatprep.subr.bf16.mxu1 %v740_v0  ;;  %v420_v36 = vld [vmem:[%s892_s6] sm:$0xff]  ;;  %v421_v37 = vld [vmem:[%s892_s6 + $0x8] sm:$0xff]  ;;  %v423_v52 = vld [vmem:[%s892_s6 + $0x18] sm:$0xff] }
  0x1e   :  { %571 = vmatprep.subr.bf16.mxu0 %v666_v7  ;;  %v644_v38 = vpack.c.bf16 %v421_v37, %v420_v36  ;;  %v549_v39 = vld [vmem:[%s889_s3] ss:$0 sm:$0xff]  ;;  %v648_v53 = vpack.c.bf16 %v423_v52, %v422_v51 }
  0x1f   :  { %v558_v54 = vld [vmem:[%s891_s5] ss:$0 sm:$0xff]  ;;  %s742_s5 = smov [#allocation5]  }
  0x20   :  { %610 = vmatpush3.bf16.msra.mxu1 %v681_v19  ;;  %v562_v1 = vld [vmem:[%s893_s7] ss:$0 sm:$0xff]  ;;  %s519_s28 = sshll.u32 %s742_s5, 4  ;;  %s520_s28 = int_to_ptr.vmem [resolvable:$true] %s519_s28 }
  0x21   :  { %572 = vmatpush3.bf16.msra.mxu0 %v667_v8  ;;  %611 = vmatprep.subr.bf16.mxu1 %v740_v0  ;;  %s711_s29 = scalar_lea.vmem %s520_s28, 256  ;;  %p716_p9 = scmp.lt.s32.totalorder %s520_s28, %s520_s28 }
  0x22   :  { %573 = vmatprep.subr.bf16.mxu0 %v668_v9  ;;  %p712_p8 = scmp.ne.s32.totalorder %s520_s28, %s711_s29  ;;  %p717_p10 = scmp.lt.s32.totalorder %s711_s29, %s711_s29 }
  0x24   :  { %612 = vmatpush3.bf16.msra.mxu1 %v682_v21  ;;  %p718_p11 = por %p717_p10, %p716_p9 }
  0x25   :  { %574 = vmatpush3.bf16.msra.mxu0 %v669_v10  ;;  %613 = vmatprep.subr.bf16.mxu1 %v740_v0 }
  0x26   :  { %575 = vmatprep.subr.bf16.mxu0 %v670_v11  ;;  %p719_p12 = pnand %p718_p11, %p712_p8 }
  0x28   :  { %614 = vmatpush3.bf16.msra.mxu1 %v683_v23 }
  0x29   :  { %576 = vmatpush3.bf16.msra.mxu0 %v671_v12  ;;  %615 = vmatprep.subr.bf16.mxu1 %v740_v0 }
  0x2a   :  { %577 = vmatprep.subr.bf16.mxu0 %v672_v15 }
  0x2c   :  { %616 = vmatpush3.bf16.msra.mxu1 %v684_v24 }
  0x2d   :  { %578 = vmatpush3.bf16.msra.mxu0 %v673_v17  ;;  %617 = vmatprep.subr.bf16.mxu1 %v740_v0 }
  0x2e   :  { %579 = vmatprep.subr.bf16.mxu0 %v674_v18 }
  0x30   :  { %618 = vmatpush3.bf16.msra.mxu1 %v685_v25 }
  0x31   :  { %580 = vmatpush3.bf16.msra.mxu0 %v675_v20  ;;  %619 = vmatprep.subr.bf16.mxu1 %v740_v0 }
  0x32   :  { %625 = vmatprep.subr.bf16.mxu0 %v740_v0 }
  0x34   :  { %218 = vmatmul.mubr.bf16.vlgmr.msra.gmra.mrb[0].mxu0 %v676_v22  ;;  %620 = vmatpush3.bf16.msra.mxu1 %v686_v26 }
  0x35   :  { %629 = vmatprep.mubr.msk.bf16.mxu0 %vm741_vm0, %v740_v0  ;;  %626 = vmatpush3.bf16.msra.mxu0 %v687_v34 }
  0x36   :  { %627 = vmatprep.subr.bf16.mxu0 %v740_v0  ;;  %645 = vmatprep.subr.bf16.mxu1 %v644_v38 }
  0x39   :  { %628 = vmatpush3.bf16.msra.mxu0 %v688_v35 }
 0x107   :  { %v581_v27 = vpop.f32.mrb[0].mxu0 }
 0x108   :  { %v582_v28 = vpop.f32.mrb[1].mxu0 }
 0x109   :  { %v583_v29 = vadd.f32 %v582_v28, %v581_v27  ;;  %v584_v30 = vpop.f32.mrb[2].mxu0 }
 0x10a   :  { %v585_v31 = vpop.f32.mrb[3].mxu0 }
 0x10b   :  { %v586_v32 = vadd.f32 %v585_v31, %v584_v30 }
 0x10d   :  { %v226_v33 = vpack.c.bf16 %v586_v32, %v583_v29 }
 0x10f   :  { %622 = vmatmul.mubr.bf16.vlgmr.msra.gmra.mrb[0].mxu1 %v226_v33 }
 0x110   :  { %647 = vmatpush3.bf16.msra.mxu1 %v644_v38 }
 0x111   :  { %649 = vmatprep.subr.bf16.mxu1 %v648_v53 }
 0x114   :  { %651 = vmatpush3.bf16.msra.mxu1 %v648_v53 }
 0x1e2   :  { %v332_v40 = vpop.f32.mrb[0].mxu1 }
 0x1e3   :  { %v333_v41 = vadd.f32 %v549_v39, %v332_v40  ;;  %v623_v42 = vpop.f32.mrb[1].mxu1 }
 0x1e4   :  { %v335_v43 = vpop.f32.mrb[2].mxu1 }
 0x1e5   :  { %v341_v44 = vmul.f32 0.01, %v333_v41  ;;  %v336_v45 = vadd.f32 %v549_v39, %v335_v43  ;;  %v624_v46 = vpop.f32.mrb[3].mxu1  ;;  %vm339_vm1 = vcmp.gt.f32.partialorder %v333_v41, 0.0 }
 0x1e7   :  { %vm340_vm2 = vcmp.gt.f32.partialorder %v336_v45, 0.0  ;;  %v342_v47 = vmul.f32 0.01, %v336_v45  ;;  %v343_v48 = vsel %vm339_vm1, %v333_v41, %v341_v44 }
 0x1e9   :  { %v344_v49 = vsel %vm340_vm2, %v336_v45, %v342_v47 }
 0x1ea   :  { %v345_v50 = vpack.c.bf16 %v344_v49, %v343_v48 }
 0x1ec   :  { %630 = vmatmul.mubr.msk.bf16.vlgmr.msra.gmra.mrb[4].mxu0 %vm369_vm3, %v345_v50 }
 0x2bf   :  { %v407_v55 = vpop.f32.mrb[4].mxu0 }
 0x2c0   :  { %v408_v56 = vadd.f32 %v558_v54, %v407_v55  ;;  %v631_v57 = vpop.f32.mrb[5].mxu0 }
 0x2c1   :  { %v410_v58 = vpop.f32.mrb[6].mxu0 }
 0x2c2   :  { %vm414_vm4 = vcmp.gt.f32.partialorder %v408_v56, 0.0  ;;  %v416_v59 = vmul.f32 0.01, %v408_v56  ;;  %v411_v60 = vadd.f32 %v558_v54, %v410_v58  ;;  %v632_v61 = vpop.f32.mrb[7].mxu0 }
 0x2c4   :  { %vm415_vm5 = vcmp.gt.f32.partialorder %v411_v60, 0.0  ;;  %v417_v62 = vmul.f32 0.01, %v411_v60  ;;  %v418_v63 = vsel %vm414_vm4, %v408_v56, %v416_v59 }
 0x2c5   :  { %641 = vmatprep.mubr.msk.f32.mxu1 %vm369_vm3, %v418_v63 }
 0x2c6   :  { %v419_v0 = vsel %vm415_vm5, %v411_v60, %v417_v62 }
 0x2c7   :  { %642 = vmatmul.mubr.msk.f32.vlgmr.msra.gmra.mrb[4].mxu1 %vm369_vm3, %v419_v0 }
 0x39a   :  { %v643_v2 = vpop.f32.mrb[4].mxu1 }
 0x39b   :  { %v509_v3 = vadd.f32 %v643_v2, %v562_v1  ;;  %v503_v4 = vpop.f32.mrb[5].mxu1 }
 0x39c   :  { %v504_v5 = vadd.f32 %v562_v1, %v503_v4 }
 0x39d   :  { %513 = vst [vmem:[#allocation5 + $0x8] sm:$0xff] %v509_v3 }
 0x39e   :  { %512 = vst [vmem:[#allocation5] sm:$0xff] %v504_v5 }
 0x39f   :  { %722 = shalt.err (!%p719_p12)
}
 0x3a0   :  { %s723_s7 = scalar_lea.hbm %s894_s8, 256 }
 0x3a1   :  { %p724_p13 = scmp.ne.s32.totalorder %s894_s8, %s723_s7  ;;  %p727_p0 = scmp.lt.u32.totalorder %s723_s7, %s894_s8 }
 0x3a3   :  { %p729_p1 = pnand %p727_p0, %p724_p13 }
 0x3a5   :  { %732 = shalt.err (!%p729_p1)
}
 0x3a6   :  { %s743_s13 = smov 128   ;;  %s744_s14 = smov 8  }
 0x3a7   :  { %525 = dma.vmem_to_hbm [thread:$0]  %s520_s28, 256, %s894_s8, [#allocation4], %s743_s13, %s743_s13, %s744_s14  }
 0x3a8   :  { %735 = dma.done.wait [#allocation4], 256  }
 0x3a9   :  { %736 = vsyncadd [#allocation4], 4294967040 }
 0x3aa   :  { %529 = vsyncpa [#allocation3], 1 }
 0x3ab   :  { %530 = vsyncpa [#allocation4], 1 }

// kernel: tpu_custom_call.1
= control target key start
LH: loop header
LB: loop body
LE: loop exit
PB: predicated region body
PF: predicated region fallthrough
CT: control target
= control target key end

     0   :  { %13 = vsyncpa [#allocation3], 0  ;;  %s886_s0 = inlined_call_operand.vmem [shape: bf16[16,256], index: 0, kind: input, shape index: {}]   ;;  %s887_s1 = inlined_call_operand.hbm [shape: bf16[256,128], index: 1, kind: input, shape index: {}]   ;;  %s888_s2 = inlined_call_operand.vmem [shape: bf16[128,32], index: 2, kind: input, shape index: {}]   ;;  %s889_s3 = inlined_call_operand.vmem [shape: f32[1,32], index: 3, kind: input, shape index: {}]   ;;  %s890_s4 = inlined_call_operand.vmem [shape: bf16[32,32], index: 4, kind: input, shape index: {}]   ;;  %s891_s5 = inlined_call_operand.vmem [shape: f32[1,32], index: 5, kind: input, shape index: {}]   ;;  %s892_s6 = inlined_call_operand.vmem [shape: f32[32,128], index: 6, kind: input, shape index: {}]   ;;  %s893_s7 = inlined_call_operand.vmem [shape: f32[1,128], index: 7, kind: input, shape index: {}]   ;;  %s894_s8 = inlined_call_operand.hbm [shape: f32[16,128], index: 8, kind: output, shape index: {}]  }
   0x1   :  { %14 = vsyncpa [#allocation4], 0  ;;  %s737_s27 = smov [#allocation2]   ;;  %s689_s9 = scalar_lea.hbm %s887_s1, 2048 }
   0x2   :  { %s22_s28 = sshll.u32 %s737_s27, 4  ;;  %p690_p0 = scmp.ne.s32.totalorder %s887_s1, %s689_s9  ;;  %s23_s28 = int_to_ptr.vmem [resolvable:$true] %s22_s28 }
   0x3   :  { %p693_p1 = scmp.lt.u32.totalorder %s689_s9, %s887_s1 }
   0x5   :  { %p695_p2 = pnand %p693_p1, %p690_p0 }
   0x7   :  { %698 = shalt.err (!%p695_p2)
}
   0x8   :  { %s699_s14 = scalar_lea.vmem %s23_s28, 2048  ;;  %p704_p4 = scmp.lt.s32.totalorder %s23_s28, %s23_s28 }
   0x9   :  { %p700_p3 = scmp.ne.s32.totalorder %s23_s28, %s699_s14  ;;  %p705_p5 = scmp.lt.s32.totalorder %s699_s14, %s699_s14 }
   0xb   :  { %p706_p6 = por %p705_p5, %p704_p4 }
   0xd   :  { %p707_p7 = pnand %p706_p6, %p700_p3 }
   0xf   :  { %710 = shalt.err (!%p707_p7)
}
  0x10   :  { %s738_s15 = smov 64   ;;  %s739_s16 = smov 4  }
  0x11   :  { %28 = dma.hbm_to_vmem [thread:$0]  %s887_s1, 2048, %s23_s28, [#allocation3], %s738_s15, %s738_s15, %s739_s16  }
  0x12   :  { %733 = dma.done.wait [#allocation3], 2048  }
  0x13   :  { %734 = vsyncadd [#allocation3], 4294965248  ;;  %v740_v0 = vmov 0.0   ;;  %v660_v1 = vld [vmem:[#allocation2 + $0x40] sm:$0xff]   ;;  %v662_v3 = vld [vmem:[#allocation2 + $0x48] sm:$0xff]   ;;  %vm741_vm0 = vmmov 0  }
  0x14   :  { %605 = vmatprep.subr.bf16.mxu1 %v740_v0  ;;  %v661_v2 = vld [vmem:[#allocation2] sm:$0xff]   ;;  %565 = vmatprep.subr.bf16.mxu0 %v660_v1  ;;  %v663_v4 = vld [vmem:[#allocation2 + $0x8] sm:$0xff]   ;;  %v664_v5 = vld [vmem:[#allocation2 + $0x50] sm:$0xff]   ;;  %vm369_vm3 = vcmask 261120  }
  0x15   :  { %566 = vmatpush3.bf16.msra.mxu0 %v661_v2  ;;  %v665_v6 = vld [vmem:[#allocation2 + $0x10] sm:$0xff]   ;;  %v666_v7 = vld [vmem:[#allocation2 + $0x58] sm:$0xff]   ;;  %v668_v9 = vld [vmem:[#allocation2 + $0x60] sm:$0xff]   ;;  %621 = vmatprep.mubr.msk.bf16.mxu1 %vm741_vm0, %v740_v0 }
  0x16   :  { %567 = vmatprep.subr.bf16.mxu0 %v662_v3  ;;  %v667_v8 = vld [vmem:[#allocation2 + $0x18] sm:$0xff]   ;;  %v669_v10 = vld [vmem:[#allocation2 + $0x20] sm:$0xff]   ;;  %v670_v11 = vld [vmem:[#allocation2 + $0x68] sm:$0xff]  }
  0x17   :  { %v671_v12 = vld [vmem:[#allocation2 + $0x28] sm:$0xff]   ;;  %v679_v14 = vld [vmem:[%s888_s2] sm:$0xff]   ;;  %v672_v15 = vld [vmem:[#allocation2 + $0x70] sm:$0xff]  }
  0x18   :  { %v678_v13 = vld [vmem:[%s886_s0 + $0x4] ss:$8 sps:$4 sm:$0xff]   ;;  %606 = vmatpush3.bf16.msra.mxu1 %v679_v14  ;;  %v673_v17 = vld [vmem:[#allocation2 + $0x30] sm:$0xff]   ;;  %v674_v18 = vld [vmem:[#allocation2 + $0x78] sm:$0xff]  }
  0x19   :  { %568 = vmatpush3.bf16.msra.mxu0 %v663_v4  ;;  %217 = vmatprep.mubr.bf16.mxu0 %v678_v13  ;;  %v680_v16 = vld [vmem:[%s888_s2 + $0x8] sm:$0xff]   ;;  %v681_v19 = vld [vmem:[%s888_s2 + $0x10] sm:$0xff]   ;;  %v675_v20 = vld [vmem:[#allocation2 + $0x38] sm:$0xff]  }
  0x1a   :  { %569 = vmatprep.subr.bf16.mxu0 %v664_v5  ;;  %607 = vmatprep.subr.bf16.mxu1 %v740_v0  ;;  %v682_v21 = vld [vmem:[%s888_s2 + $0x18] sm:$0xff]   ;;  %v676_v22 = vld [vmem:[%s886_s0] ss:$8 sps:$4 sm:$0xff]   ;;  %v685_v25 = vld [vmem:[%s888_s2 + $0x30] sm:$0xff]  }
  0x1b   :  { %v683_v23 = vld [vmem:[%s888_s2 + $0x20] sm:$0xff]   ;;  %v684_v24 = vld [vmem:[%s888_s2 + $0x28] sm:$0xff]   ;;  %v686_v26 = vld [vmem:[%s888_s2 + $0x38] sm:$0xff]  }
  0x1c   :  { %608 = vmatpush3.bf16.msra.mxu1 %v680_v16  ;;  %v687_v34 = vld [vmem:[%s890_s4] sm:$0xff]   ;;  %v688_v35 = vld [vmem:[%s890_s4 + $0x8] sm:$0xff]   ;;  %v422_v51 = vld [vmem:[%s892_s6 + $0x10] sm:$0xff] }
  0x1d   :  { %570 = vmatpush3.bf16.msra.mxu0 %v665_v6  ;;  %609 = vmatprep.subr.bf16.mxu1 %v740_v0  ;;  %v420_v36 = vld [vmem:[%s892_s6] sm:$0xff]  ;;  %v421_v37 = vld [vmem:[%s892_s6 + $0x8] sm:$0xff]  ;;  %v423_v52 = vld [vmem:[%s892_s6 + $0x18] sm:$0xff] }
  0x1e   :  { %571 = vmatprep.subr.bf16.mxu0 %v666_v7  ;;  %v644_v38 = vpack.c.bf16 %v421_v37, %v420_v36  ;;  %v549_v39 = vld [vmem:[%s889_s3] ss:$0 sm:$0xff]  ;;  %v648_v53 = vpack.c.bf16 %v423_v52, %v422_v51 }
  0x1f   :  { %v558_v54 = vld [vmem:[%s891_s5] ss:$0 sm:$0xff]  ;;  %s742_s5 = smov [#allocation5]  }
  0x20   :  { %610 = vmatpush3.bf16.msra.mxu1 %v681_v19  ;;  %v562_v1 = vld [vmem:[%s893_s7] ss:$0 sm:$0xff]  ;;  %s519_s28 = sshll.u32 %s742_s5, 4  ;;  %s520_s28 = int_to_ptr.vmem [resolvable:$true] %s519_s28 }
  0x21   :  { %572 = vmatpush3.bf16.msra.mxu0 %v667_v8  ;;  %611 = vmatprep.subr.bf16.mxu1 %v740_v0  ;;  %s711_s29 = scalar_lea.vmem %s520_s28, 256  ;;  %p716_p9 = scmp.lt.s32.totalorder %s520_s28, %s520_s28 }
  0x22   :  { %573 = vmatprep.subr.bf16.mxu0 %v668_v9  ;;  %p712_p8 = scmp.ne.s32.totalorder %s520_s28, %s711_s29  ;;  %p717_p10 = scmp.lt.s32.totalorder %s711_s29, %s711_s29 }
  0x24   :  { %612 = vmatpush3.bf16.msra.mxu1 %v682_v21  ;;  %p718_p11 = por %p717_p10, %p716_p9 }
  0x25   :  { %574 = vmatpush3.bf16.msra.mxu0 %v669_v10  ;;  %613 = vmatprep.subr.bf16.mxu1 %v740_v0 }
  0x26   :  { %575 = vmatprep.subr.bf16.mxu0 %v670_v11  ;;  %p719_p12 = pnand %p718_p11, %p712_p8 }
  0x28   :  { %614 = vmatpush3.bf16.msra.mxu1 %v683_v23 }
  0x29   :  { %576 = vmatpush3.bf16.msra.mxu0 %v671_v12  ;;  %615 = vmatprep.subr.bf16.mxu1 %v740_v0 }
  0x2a   :  { %577 = vmatprep.subr.bf16.mxu0 %v672_v15 }
  0x2c   :  { %616 = vmatpush3.bf16.msra.mxu1 %v684_v24 }
  0x2d   :  { %578 = vmatpush3.bf16.msra.mxu0 %v673_v17  ;;  %617 = vmatprep.subr.bf16.mxu1 %v740_v0 }
  0x2e   :  { %579 = vmatprep.subr.bf16.mxu0 %v674_v18 }
  0x30   :  { %618 = vmatpush3.bf16.msra.mxu1 %v685_v25 }
  0x31   :  { %580 = vmatpush3.bf16.msra.mxu0 %v675_v20  ;;  %619 = vmatprep.subr.bf16.mxu1 %v740_v0 }
  0x32   :  { %625 = vmatprep.subr.bf16.mxu0 %v740_v0 }
  0x34   :  { %218 = vmatmul.mubr.bf16.vlgmr.msra.gmra.mrb[0].mxu0 %v676_v22  ;;  %620 = vmatpush3.bf16.msra.mxu1 %v686_v26 }
  0x35   :  { %629 = vmatprep.mubr.msk.bf16.mxu0 %vm741_vm0, %v740_v0  ;;  %626 = vmatpush3.bf16.msra.mxu0 %v687_v34 }
  0x36   :  { %627 = vmatprep.subr.bf16.mxu0 %v740_v0  ;;  %645 = vmatprep.subr.bf16.mxu1 %v644_v38 }
  0x39   :  { %628 = vmatpush3.bf16.msra.mxu0 %v688_v35 }
 0x107   :  { %v581_v27 = vpop.f32.mrb[0].mxu0 }
 0x108   :  { %v582_v28 = vpop.f32.mrb[1].mxu0 }
 0x109   :  { %v583_v29 = vadd.f32 %v582_v28, %v581_v27  ;;  %v584_v30 = vpop.f32.mrb[2].mxu0 }
 0x10a   :  { %v585_v31 = vpop.f32.mrb[3].mxu0 }
 0x10b   :  { %v586_v32 = vadd.f32 %v585_v31, %v584_v30 }
 0x10d   :  { %v226_v33 = vpack.c.bf16 %v586_v32, %v583_v29 }
 0x10f   :  { %622 = vmatmul.mubr.bf16.vlgmr.msra.gmra.mrb[0].mxu1 %v226_v33 }
 0x110   :  { %647 = vmatpush3.bf16.msra.mxu1 %v644_v38 }
 0x111   :  { %649 = vmatprep.subr.bf16.mxu1 %v648_v53 }
 0x114   :  { %651 = vmatpush3.bf16.msra.mxu1 %v648_v53 }
 0x1e2   :  { %v332_v40 = vpop.f32.mrb[0].mxu1 }
 0x1e3   :  { %v333_v41 = vadd.f32 %v549_v39, %v332_v40  ;;  %v623_v42 = vpop.f32.mrb[1].mxu1 }
 0x1e4   :  { %v335_v43 = vpop.f32.mrb[2].mxu1 }
 0x1e5   :  { %v341_v44 = vmul.f32 0.01, %v333_v41  ;;  %v336_v45 = vadd.f32 %v549_v39, %v335_v43  ;;  %v624_v46 = vpop.f32.mrb[3].mxu1  ;;  %vm339_vm1 = vcmp.gt.f32.partialorder %v333_v41, 0.0 }
 0x1e7   :  { %vm340_vm2 = vcmp.gt.f32.partialorder %v336_v45, 0.0  ;;  %v342_v47 = vmul.f32 0.01, %v336_v45  ;;  %v343_v48 = vsel %vm339_vm1, %v333_v41, %v341_v44 }
 0x1e9   :  { %v344_v49 = vsel %vm340_vm2, %v336_v45, %v342_v47 }
 0x1ea   :  { %v345_v50 = vpack.c.bf16 %v344_v49, %v343_v48 }
 0x1ec   :  { %630 = vmatmul.mubr.msk.bf16.vlgmr.msra.gmra.mrb[4].mxu0 %vm369_vm3, %v345_v50 }
 0x2bf   :  { %v407_v55 = vpop.f32.mrb[4].mxu0 }
 0x2c0   :  { %v408_v56 = vadd.f32 %v558_v54, %v407_v55  ;;  %v631_v57 = vpop.f32.mrb[5].mxu0 }
 0x2c1   :  { %v410_v58 = vpop.f32.mrb[6].mxu0 }
 0x2c2   :  { %vm414_vm4 = vcmp.gt.f32.partialorder %v408_v56, 0.0  ;;  %v416_v59 = vmul.f32 0.01, %v408_v56  ;;  %v411_v60 = vadd.f32 %v558_v54, %v410_v58  ;;  %v632_v61 = vpop.f32.mrb[7].mxu0 }
 0x2c4   :  { %vm415_vm5 = vcmp.gt.f32.partialorder %v411_v60, 0.0  ;;  %v417_v62 = vmul.f32 0.01, %v411_v60  ;;  %v418_v63 = vsel %vm414_vm4, %v408_v56, %v416_v59 }
 0x2c5   :  { %641 = vmatprep.mubr.msk.f32.mxu1 %vm369_vm3, %v418_v63 }
 0x2c6   :  { %v419_v0 = vsel %vm415_vm5, %v411_v60, %v417_v62 }
 0x2c7   :  { %642 = vmatmul.mubr.msk.f32.vlgmr.msra.gmra.mrb[4].mxu1 %vm369_vm3, %v419_v0 }
 0x39a   :  { %v643_v2 = vpop.f32.mrb[4].mxu1 }
 0x39b   :  { %v509_v3 = vadd.f32 %v643_v2, %v562_v1  ;;  %v503_v4 = vpop.f32.mrb[5].mxu1 }
 0x39c   :  { %v504_v5 = vadd.f32 %v562_v1, %v503_v4 }
 0x39d   :  { %513 = vst [vmem:[#allocation5 + $0x8] sm:$0xff] %v509_v3 }
 0x39e   :  { %512 = vst [vmem:[#allocation5] sm:$0xff] %v504_v5 }
 0x39f   :  { %722 = shalt.err (!%p719_p12)
}
 0x3a0   :  { %s723_s7 = scalar_lea.hbm %s894_s8, 256 }
 0x3a1   :  { %p724_p13 = scmp.ne.s32.totalorder %s894_s8, %s723_s7  ;;  %p727_p0 = scmp.lt.u32.totalorder %s723_s7, %s894_s8 }
 0x3a3   :  { %p729_p1 = pnand %p727_p0, %p724_p13 }
 0x3a5   :  { %732 = shalt.err (!%p729_p1)
}
 0x3a6   :  { %s743_s13 = smov 128   ;;  %s744_s14 = smov 8  }
 0x3a7   :  { %525 = dma.vmem_to_hbm [thread:$0]  %s520_s28, 256, %s894_s8, [#allocation4], %s743_s13, %s743_s13, %s744_s14  }
 0x3a8   :  { %735 = dma.done.wait [#allocation4], 256  }
 0x3a9   :  { %736 = vsyncadd [#allocation4], 4294967040 }
 0x3aa   :  { %529 = vsyncpa [#allocation3], 1 }
 0x3ab   :  { %530 = vsyncpa [#allocation4], 1 }

</bundles_post_ra>
